<compile_context>
chip_gen: v7x
topology: tpu7x:2x2x1
jax: 0.10.0
libtpu: 0.0.40
codegen_flags: <defaults>
</compile_context>

<pallas_src>
import functools

import jax
import jax.numpy as jnp
from jax.experimental import pallas as pl
from jax.experimental.pallas import tpu as pltpu


def _se_kernel(x_ref, w1_ref, b1_ref, w2_ref, b2_ref, o_ref, *, inv_hw):
    # x_ref / o_ref: (Bt, C, HW) in the input's native dtype.
    # w1_ref: (C, Cr)  b1_ref: (1, Cr)  w2_ref: (Cr, C)  b2_ref: (1, C), all f32.

    # --- squeeze: global average pool over HW with f32 accumulation.
    # The f32 cast is consumed immediately by the reduction; nothing f32-sized
    # stays live across the MLP.
    y = jnp.sum(x_ref[...].astype(jnp.float32), axis=-1) * inv_hw        # (Bt, C)

    # --- excitation: Linear -> ReLU -> Linear -> Sigmoid (one MXU pass each per tile)
    h = jnp.dot(y, w1_ref[...], preferred_element_type=jnp.float32) + b1_ref[...]
    h = jnp.maximum(h, 0.0)                                              # (Bt, Cr)
    s = jax.nn.sigmoid(
        jnp.dot(h, w2_ref[...], preferred_element_type=jnp.float32) + b2_ref[...]
    )                                                                    # (Bt, C)

    # --- scale: re-read x (already resident in VMEM, the second load + cast is
    # free under the DMA bound), broadcast the per-channel gate over HW, and
    # store back in the native dtype.
    o_ref[...] = (x_ref[...].astype(jnp.float32) * s[:, :, None]).astype(o_ref.dtype)


def _choose_bt(B, bytes_per_batch, target_bytes,
               min_steps=8, min_blk_bytes=256 * 1024):
    """Largest divisor of B whose block is <= target, backed off so the grid
    keeps >= min_steps steps (for v7x megacore sharding) unless that would
    shrink blocks below the pipelining sweet spot."""
    divs = [d for d in range(1, B + 1) if B % d == 0]
    bt = 1
    for d in divs:
        if d * bytes_per_batch <= target_bytes:
            bt = d
    while bt > 1 and B // bt < min_steps:
        smaller = [d for d in divs if d < bt]
        cand = smaller[-1]
        if cand * bytes_per_batch < min_blk_bytes:
            break
        bt = cand
    return bt


def se_block(x, w1, b1, w2, b2):
    """Squeeze-and-excitation forward.

    x : (B, C, H, W), any float dtype (kept native HBM-side; compute in f32).
    w1: (C, C//r)  = fc1.weight.T     b1: (C//r,) = fc1.bias
    w2: (C//r, C)  = fc2.weight.T     b2: (C,)    = fc2.bias
    Returns (B, C, H, W) in x.dtype.
    """
    B, C, H, W = x.shape
    HW = H * W
    Cr = w1.shape[1]
    itemsize = jnp.dtype(x.dtype).itemsize

    x_flat = x.reshape(B, C, HW)                 # metadata-only reshape
    w1f = w1.astype(jnp.float32)
    w2f = w2.astype(jnp.float32)
    b1f = b1.reshape(1, Cr).astype(jnp.float32)
    b2f = b2.reshape(1, C).astype(jnp.float32)

    # ---- generation-aware VMEM budget (v7x: 64 MiB/TC, v5e/v6e: 128 MiB) ----
    try:
        vmem_cap = int(pltpu.get_tpu_info().vmem_capacity_bytes)
    except Exception:
        vmem_cap = 64 * 1024 * 1024              # assume the smallest (v7x)
    vmem_cap_budget = (vmem_cap * 3) // 4

    # ---- batch tiling: aim for ~1.5 MiB x blocks per grid step ----
    bytes_per_batch = C * HW * itemsize
    target_blk = 1536 * 1024
    bt = _choose_bt(B, bytes_per_batch, target_blk)
    grid_len = B // bt

    blk_bytes = bt * bytes_per_batch             # native-dtype x / out block
    f32_blk_bytes = bt * C * HW * 4              # transient f32 cast of one block
    weights_bytes = (C * Cr + Cr + Cr * C + C) * 4
    needed = 2 * (2 * blk_bytes) + f32_blk_bytes + weights_bytes + (2 << 20)
    vmem_bytes = int(min(vmem_cap_budget, max(16 << 20, needed)))

    kernel = functools.partial(_se_kernel, inv_hw=1.0 / HW)

    out = pl.pallas_call(
        kernel,
        out_shape=jax.ShapeDtypeStruct((B, C, HW), x.dtype),
        grid=(grid_len,),
        in_specs=[
            pl.BlockSpec((bt, C, HW), lambda b: (b, 0, 0)),  # x tile (Bt batches)
            pl.BlockSpec((C, Cr), lambda b: (0, 0)),         # fc1 weight (resident)
            pl.BlockSpec((1, Cr), lambda b: (0, 0)),         # fc1 bias
            pl.BlockSpec((Cr, C), lambda b: (0, 0)),         # fc2 weight (resident)
            pl.BlockSpec((1, C), lambda b: (0, 0)),          # fc2 bias
        ],
        out_specs=pl.BlockSpec((bt, C, HW), lambda b: (b, 0, 0)),
        compiler_params=pltpu.CompilerParams(
            dimension_semantics=("parallel",),
            vmem_limit_bytes=vmem_bytes,
        ),
    )(x_flat, w1f, b1f, w2f, b2f)

    return out.reshape(B, C, H, W)


def _reference(x, w1, b1, w2, b2):
    # Pure-JAX reference mirroring the PyTorch forward (in f32).
    xf = x.astype(jnp.float32)
    y = jnp.mean(xf, axis=(2, 3))                            # (B, C)
    h = jnp.maximum(y @ w1 + b1, 0.0)
    s = jax.nn.sigmoid(h @ w2 + b2)
    return (xf * s[:, :, None, None]).astype(x.dtype)


if __name__ == "__main__":
    # Shapes consistent with SEBlock(channel=32, reduction=16): hidden = 32 // 16 = 2
    B, C, H, W = 2, 32, 8, 8
    reduction = 16
    Cr = C // reduction

    key = jax.random.PRNGKey(0)
    kx, k1, k2, k3, k4 = jax.random.split(key, 5)

    x = jax.random.normal(kx, (B, C, H, W), dtype=jnp.float32)
    # nn.Linear weights, pre-transposed for x @ W (torch computes y @ W.T + b).
    w1 = jax.random.normal(k1, (C, Cr), dtype=jnp.float32) * 0.1   # fc1.weight.T
    b1 = jax.random.normal(k2, (Cr,), dtype=jnp.float32) * 0.1     # fc1.bias
    w2 = jax.random.normal(k3, (Cr, C), dtype=jnp.float32) * 0.1   # fc2.weight.T
    b2 = jax.random.normal(k4, (C,), dtype=jnp.float32) * 0.1      # fc2.bias

    out = se_block(x, w1, b1, w2, b2)
    out = jax.block_until_ready(out)
    ref = _reference(x, w1, b1, w2, b2)
    assert out.shape == (B, C, H, W)
    assert out.dtype == x.dtype
    assert jnp.allclose(out, ref, atol=1e-5, rtol=1e-5), "mismatch vs reference (B=2)"

    # Second check: a larger batch so multiple batch elements share one tile
    # (exercises the (Bt, C, HW) path and the batched MLP matmul).
    B2 = 8
    x2 = jax.random.normal(jax.random.PRNGKey(1), (B2, C, H, W), dtype=jnp.float32)
    out2 = jax.block_until_ready(se_block(x2, w1, b1, w2, b2))
    ref2 = _reference(x2, w1, b1, w2, b2)
    assert jnp.allclose(out2, ref2, atol=1e-5, rtol=1e-5), "mismatch vs reference (B=8)"

    print("KERNEL_OK")
</pallas_src>

<mosaic_0001>
module attributes {stable_mosaic.version = 11 : i64} {
  func.func @_se_kernel(%arg0: i32, %arg1: memref<2x32x64xf32, #tpu.memory_space<vmem>>, %arg2: memref<32x2xf32, #tpu.memory_space<vmem>>, %arg3: memref<1x2xf32, #tpu.memory_space<vmem>>, %arg4: memref<2x32xf32, #tpu.memory_space<vmem>>, %arg5: memref<1x32xf32, #tpu.memory_space<vmem>>, %arg6: memref<2x32x64xf32, #tpu.memory_space<vmem>>) attributes {dimension_semantics = [#tpu.dimension_semantics<parallel>], iteration_bounds = array<i64: 1>, scalar_prefetch = 0 : i64, scratch_operands = 0 : i64, tpu.core_type = #tpu.core_type<tc>, window_params = [{transform_indices = @transform_0, window_bounds = array<i64: 2, 32, 64>}, {pipeline_mode = #tpu.pipeline_mode<synchronous>, transform_indices = @transform_1, window_bounds = array<i64: 32, 2>}, {pipeline_mode = #tpu.pipeline_mode<synchronous>, transform_indices = @transform_2, window_bounds = array<i64: 1, 2>}, {pipeline_mode = #tpu.pipeline_mode<synchronous>, transform_indices = @transform_3, window_bounds = array<i64: 2, 32>}, {pipeline_mode = #tpu.pipeline_mode<synchronous>, transform_indices = @transform_4, window_bounds = array<i64: 1, 32>}, {transform_indices = @transform_5, window_bounds = array<i64: 2, 32, 64>}]} {
    %c0 = arith.constant 0 : index
    %c0_0 = arith.constant 0 : index
    %c0_1 = arith.constant 0 : index
    %0 = vector.load %arg1[%c0, %c0_0, %c0_1] : memref<2x32x64xf32, #tpu.memory_space<vmem>>, vector<2x32x64xf32>
    %cst = arith.constant dense<0.000000e+00> : vector<2x32xf32>
    %1 = vector.multi_reduction <add>, %0, %cst [2] : vector<2x32x64xf32> to vector<2x32xf32>
    %cst_2 = arith.constant 1.562500e-02 : f32
    %2 = vector.broadcast %cst_2 : f32 to vector<2x32xf32>
    %3 = arith.mulf %1, %2 : vector<2x32xf32>
    %c0_3 = arith.constant 0 : index
    %c0_4 = arith.constant 0 : index
    %4 = vector.load %arg2[%c0_3, %c0_4] : memref<32x2xf32, #tpu.memory_space<vmem>>, vector<32x2xf32>
    %cst_5 = arith.constant dense<0.000000e+00> : vector<2x2xf32>
    %5 = tpu.matmul %3, %4, %cst_5 {dimension_numbers = #tpu.dot_dimension_numbers<[1], [0], [0], [1], [0, 0, 1, 1], [], []>} : vector<2x32xf32>, vector<32x2xf32>, vector<2x2xf32> -> vector<2x2xf32>
    %c0_6 = arith.constant 0 : index
    %c0_7 = arith.constant 0 : index
    %6 = vector.load %arg3[%c0_6, %c0_7] : memref<1x2xf32, #tpu.memory_space<vmem>>, vector<1x2xf32>
    %7 = vector.broadcast %6 : vector<1x2xf32> to vector<2x2xf32>
    %8 = arith.addf %5, %7 : vector<2x2xf32>
    %cst_8 = arith.constant 0.000000e+00 : f32
    %9 = vector.broadcast %cst_8 : f32 to vector<2x2xf32>
    %10 = arith.maximumf %8, %9 : vector<2x2xf32>
    %c0_9 = arith.constant 0 : index
    %c0_10 = arith.constant 0 : index
    %11 = vector.load %arg4[%c0_9, %c0_10] : memref<2x32xf32, #tpu.memory_space<vmem>>, vector<2x32xf32>
    %cst_11 = arith.constant dense<0.000000e+00> : vector<2x32xf32>
    %12 = tpu.matmul %10, %11, %cst_11 {dimension_numbers = #tpu.dot_dimension_numbers<[1], [0], [0], [1], [0, 0, 1, 1], [], []>} : vector<2x2xf32>, vector<2x32xf32>, vector<2x32xf32> -> vector<2x32xf32>
    %c0_12 = arith.constant 0 : index
    %c0_13 = arith.constant 0 : index
    %13 = vector.load %arg5[%c0_12, %c0_13] : memref<1x32xf32, #tpu.memory_space<vmem>>, vector<1x32xf32>
    %14 = vector.broadcast %13 : vector<1x32xf32> to vector<2x32xf32>
    %15 = arith.addf %12, %14 : vector<2x32xf32>
    %16 = arith.negf %15 : vector<2x32xf32>
    %17 = math.exp %16 : vector<2x32xf32>
    %cst_14 = arith.constant 1.000000e+00 : f32
    %18 = vector.broadcast %cst_14 : f32 to vector<2x32xf32>
    %19 = arith.addf %18, %17 : vector<2x32xf32>
    %20 = arith.divf %18, %19 : vector<2x32xf32>
    %c0_15 = arith.constant 0 : index
    %c0_16 = arith.constant 0 : index
    %c0_17 = arith.constant 0 : index
    %21 = vector.load %arg1[%c0_15, %c0_16, %c0_17] : memref<2x32x64xf32, #tpu.memory_space<vmem>>, vector<2x32x64xf32>
    %22 = vector.shape_cast %20 : vector<2x32xf32> to vector<2x32x1xf32>
    %23 = vector.broadcast %22 : vector<2x32x1xf32> to vector<2x32x64xf32>
    %24 = arith.mulf %21, %23 : vector<2x32x64xf32>
    %c0_18 = arith.constant 0 : index
    %c0_19 = arith.constant 0 : index
    %c0_20 = arith.constant 0 : index
    %25 = vector.load %arg6[%c0_18, %c0_19, %c0_20] : memref<2x32x64xf32, #tpu.memory_space<vmem>>, vector<2x32x64xf32>
    tpu.vector_store %arg6[%c0_18, %c0_19, %c0_20], %24 {strides = array<i32>} : memref<2x32x64xf32, #tpu.memory_space<vmem>>, vector<2x32x64xf32>,
    return
  }
  func.func @transform_0(%arg0: i32) -> (i32, i32, i32) {
    %c0_i32 = arith.constant 0 : i32
    %c0_i32_0 = arith.constant 0 : i32
    %c0_i32_1 = arith.constant 0 : i32
    return %arg0, %c0_i32, %c0_i32_0 : i32, i32, i32
  }
  func.func @transform_1(%arg0: i32) -> (i32, i32) {
    %c0_i32 = arith.constant 0 : i32
    %c0_i32_0 = arith.constant 0 : i32
    %c0_i32_1 = arith.constant 0 : i32
    return %c0_i32, %c0_i32_0 : i32, i32
  }
  func.func @transform_2(%arg0: i32) -> (i32, i32) {
    %c0_i32 = arith.constant 0 : i32
    %c0_i32_0 = arith.constant 0 : i32
    %c0_i32_1 = arith.constant 0 : i32
    return %c0_i32, %c0_i32_0 : i32, i32
  }
  func.func @transform_3(%arg0: i32) -> (i32, i32) {
    %c0_i32 = arith.constant 0 : i32
    %c0_i32_0 = arith.constant 0 : i32
    %c0_i32_1 = arith.constant 0 : i32
    return %c0_i32, %c0_i32_0 : i32, i32
  }
  func.func @transform_4(%arg0: i32) -> (i32, i32) {
    %c0_i32 = arith.constant 0 : i32
    %c0_i32_0 = arith.constant 0 : i32
    %c0_i32_1 = arith.constant 0 : i32
    return %c0_i32, %c0_i32_0 : i32, i32
  }
  func.func @transform_5(%arg0: i32) -> (i32, i32, i32) {
    %c0_i32 = arith.constant 0 : i32
    %c0_i32_0 = arith.constant 0 : i32
    %c0_i32_1 = arith.constant 0 : i32
    return %arg0, %c0_i32, %c0_i32_0 : i32, i32, i32
  }
}

</mosaic_0001>

<bundles_post_ra>
// kernel: tpu_custom_call.1
= control target key start
LH: loop header
LB: loop body
LE: loop exit
PB: predicated region body
PF: predicated region fallthrough
CT: control target
= control target key end

     0   :  { %10 = vsyncpa [#allocation3], 0  ;;  %s620_s0 = inlined_call_operand.hbm [shape: f32[2,32,64], index: 0, kind: input, shape index: {}]   ;;  %s621_s1 = inlined_call_operand.vmem [shape: f32[32,2], index: 1, kind: input, shape index: {}]   ;;  %s622_s2 = inlined_call_operand.vmem [shape: f32[1,2], index: 2, kind: input, shape index: {}]   ;;  %s623_s3 = inlined_call_operand.vmem [shape: f32[2,32], index: 3, kind: input, shape index: {}]   ;;  %s624_s4 = inlined_call_operand.vmem [shape: f32[1,32], index: 4, kind: input, shape index: {}]   ;;  %s625_s5 = inlined_call_operand.hbm [shape: f32[2,32,64], index: 5, kind: output, shape index: {}]  }
   0x1   :  { %11 = vsyncpa [#allocation4], 0  ;;  %s474_s18 = smov [#allocation2]   ;;  %s426_s22 = scalar_lea.hbm %s620_s0, 1024 }
   0x2   :  { %s17_s19 = sshll.u32 %s474_s18, 4  ;;  %p427_p0 = scmp.ne.s32.totalorder %s620_s0, %s426_s22  ;;  %s18_s19 = int_to_ptr.vmem [resolvable:$true] %s17_s19 }
   0x3   :  { %p430_p1 = scmp.lt.u32.totalorder %s426_s22, %s620_s0 }
   0x5   :  { %p432_p2 = pnand %p430_p1, %p427_p0 }
   0x7   :  { %435 = shalt.err (!%p432_p2)
}
   0x8   :  { %s436_s27 = scalar_lea.vmem %s18_s19, 1024  ;;  %p441_p4 = scmp.lt.s32.totalorder %s18_s19, %s18_s19 }
   0x9   :  { %p437_p3 = scmp.ne.s32.totalorder %s18_s19, %s436_s27  ;;  %p442_p5 = scmp.lt.s32.totalorder %s436_s27, %s436_s27 }
   0xb   :  { %p443_p6 = por %p442_p5, %p441_p4 }
   0xd   :  { %p444_p7 = pnand %p443_p6, %p437_p3 }
   0xf   :  { %447 = shalt.err (!%p444_p7)
}
  0x10   :  { %s475_s28 = smov 128   ;;  %s476_s29 = smov 8  }
  0x11   :  { %23 = dma.hbm_to_vmem [thread:$0]  %s620_s0, 1024, %s18_s19, [#allocation3], %s475_s28, %s475_s28, %s476_s29  }
  0x12   :  { %470 = dma.done.wait [#allocation3], 1024  }
  0x13   :  { %471 = vsyncadd [#allocation3], 4294966272  ;;  %vm43_vm0 = vcmask 523264   ;;  %v526_v0 = vld [vmem:[#allocation2 + $0x20] sm:$0xff]  ;;  %v530_v2 = vld [vmem:[#allocation2 + $0x28] sm:$0xff]  ;;  %v477_v19 = vmov 0.0|0.0   ;;  %v95_v24 = vlaneseq }
  0x14   :  { %v528_v1 = vld [vmem:[#allocation2] sm:$0xff]  ;;  %v56_v3 = vsel %vm43_vm0, %v526_v0, 0.0  ;;  %v536_v5 = vld [vmem:[#allocation2 + $0x8] sm:$0xff]  ;;  %v59_v6 = vsel %vm43_vm0, %v530_v2, 0.0  ;;  %v542_v8 = vld [vmem:[#allocation2 + $0x30] sm:$0xff]  ;;  %409 = vmatprep.subr.bf16.mxu0 %v477_v19  ;;  %vm478_vm1 = vmmov 0  }
  0x15   :  { %v44_v4 = vsel %vm43_vm0, %v528_v1, 0.0  ;;  %57 = vadd.xlane.f32.xlu1 %v56_v3  ;;  %v47_v7 = vsel %vm43_vm0, %v536_v5, 0.0  ;;  %v544_v9 = vld [vmem:[#allocation2 + $0x10] sm:$0xff]  ;;  %v62_v10 = vsel %vm43_vm0, %v542_v8, 0.0  ;;  %v550_v12 = vld [vmem:[#allocation2 + $0x38] sm:$0xff]  ;;  %v76_v16 = vld [vmem:[%s621_s1] sm:$0xff] }
  0x16   :  { %45 = vadd.xlane.f32.xlu0 %v44_v4  ;;  %v50_v11 = vsel %vm43_vm0, %v544_v9, 0.0  ;;  %v552_v13 = vld [vmem:[#allocation2 + $0x18] sm:$0xff]  ;;  %v65_v14 = vsel %vm43_vm0, %v550_v12, 0.0  ;;  %v77_v17 = vld [vmem:[%s621_s1 + $0x8] sm:$0xff]  ;;  %v78_v20 = vld [vmem:[%s621_s1 + $0x10] sm:$0xff]  ;;  %v479_v23 = vmov 0.0  }
  0x17   :  { %v53_v15 = vsel %vm43_vm0, %v552_v13, 0.0  ;;  %v410_v18 = vpack.c.bf16 %v77_v17, %v76_v16  ;;  %v79_v21 = vld [vmem:[%s621_s1 + $0x18] sm:$0xff]  ;;  %401 = vmatprep.mubr.msk.f32.mxu0 %vm478_vm1, %v479_v23  ;;  %404 = vmatprep.subr.mxu1 %v479_v23  ;;  %v96_v27 = vand.u32 127, %v95_v24  ;;  %v570_v29 = vshrl.u32 %v95_v24, 7  ;;  %v217_v4 = vld [vmem:[%s623_s3] sm:$0x3] }
  0x18   :  { %v413_v22 = vpack.c.bf16 %v79_v21, %v78_v20  ;;  %406 = vmatprep.mubr.msk.f32.mxu1 %vm478_vm1, %v479_v23  ;;  %vm106_vm2 = vcmask 130112   ;;  %vm113_vm3 = vcmask 195712   ;;  %vm120_vm4 = vcmask 261312  }
  0x19   :  { %60 = vadd.xlane.f32.xlu1 %v59_v6  ;;  %411 = vmatpush3.bf16.msra.mxu0 %v410_v18  ;;  %v101_v28 = vadd.s32 4294967288, %v96_v27  ;;  %v108_v32 = vadd.s32 4294967280, %v96_v27  ;;  %v115_v36 = vadd.s32 4294967272, %v96_v27  ;;  %v99_v37 = vsub.s32 %v96_v27, %v570_v29  ;;  %v380_v6 = vld [vmem:[%s622_s2] ss:$0 sm:$0xff]  ;;  %s480_s2 = smov [#allocation5]  }
  0x1a   :  { %48 = vadd.xlane.f32.xlu0 %v47_v7  ;;  %412 = vmatprep.subr.bf16.mxu0 %v477_v19  ;;  %vm141_vm5 = vcmask 1041409   ;;  %vm143_vm6 = vcmask 261120   ;;  %vm229_vm7 = vcmask 1041408   ;;  %vm225_vm8 = vcmask 15360   ;;  %s368_s3 = sshll.u32 %s480_s2, 4  ;;  %s369_s3 = int_to_ptr.vmem [resolvable:$true] %s368_s3 }
  0x1b   :  { %v104_v33 = vsub.s32 %v101_v28, %v570_v29  ;;  %v111_v38 = vsub.s32 %v108_v32, %v570_v29  ;;  %v118_v47 = vsub.s32 %v115_v36, %v570_v29  ;;  %405 = vmatpush3.msk.msra.mxu1 %vm229_vm7, %v217_v4  ;;  %p453_p9 = scmp.lt.s32.totalorder %s369_s3, %s369_s3 }
  0x1d   :  { %63 = vadd.xlane.f32.xlu1 %v62_v10  ;;  %414 = vmatpush3.bf16.msra.mxu0 %v413_v22  ;;  %v311_v22 = vsub.s32 0, %v570_v29 }
  0x1e   :  { %51 = vadd.xlane.f32.xlu0 %v50_v11 }
  0x21   :  { %66 = vadd.xlane.f32.xlu1 %v65_v14 }
  0x22   :  { %54 = vadd.xlane.f32.xlu0 %v53_v15  ;;  %v382_v15 = vld [vmem:[%s624_s4] ss:$0 sm:$0xff]  ;;  %s448_s4 = scalar_lea.vmem %s369_s3, 1024 }
  0x23   :  { %p449_p8 = scmp.ne.s32.totalorder %s369_s3, %s448_s4  ;;  %p454_p10 = scmp.lt.s32.totalorder %s448_s4, %s448_s4 }
  0x25   :  { %p455_p11 = por %p454_p10, %p453_p9 }
  0x27   :  { %p456_p12 = pnand %p455_p11, %p449_p8 }
  0xa2   :  { %v58_v25 = vpop.xlane.xlu1 %57 }
  0xa3   :  { %v46_v26 = vpop.xlane.xlu0 %45  ;;  %v72_v41 = vmul.f32 0.015625, %v58_v25  ;;  %v330_v25 = vsub.s32 1, %v570_v29 }
  0xa4   :  { %v68_v42 = vmul.f32 0.015625, %v46_v26 }
  0xa5   :  { %v125_v52 = vrot.slane %v72_v41, %v99_v37 }
  0xa6   :  { %v61_v30 = vpop.xlane.xlu1 %60  ;;  %v100_v53 = vrot.slane %v68_v42, %v99_v37 }
  0xa7   :  { %v49_v31 = vpop.xlane.xlu0 %48  ;;  %v73_v34 = vmul.f32 0.015625, %v61_v30 }
  0xa8   :  { %v69_v35 = vmul.f32 0.015625, %v49_v31 }
  0xa9   :  { %v129_v45 = vrot.slane %v73_v34, %v104_v33 }
  0xaa   :  { %v64_v39 = vpop.xlane.xlu1 %63  ;;  %v105_v46 = vrot.slane %v69_v35, %v104_v33 }
  0xab   :  { %v52_v40 = vpop.xlane.xlu0 %51  ;;  %v74_v43 = vmul.f32 0.015625, %v64_v39  ;;  %v130_v56 = vsel %vm106_vm2, %v129_v45, %v125_v52 }
  0xac   :  { %v70_v44 = vmul.f32 0.015625, %v52_v40  ;;  %v107_v57 = vsel %vm106_vm2, %v105_v46, %v100_v53 }
  0xad   :  { %v134_v48 = vrot.slane %v74_v43, %v111_v38 }
  0xae   :  { %v112_v49 = vrot.slane %v70_v44, %v111_v38  ;;  %v67_v50 = vpop.xlane.xlu1 %66 }
  0xaf   :  { %v55_v51 = vpop.xlane.xlu0 %54  ;;  %v75_v54 = vmul.f32 0.015625, %v67_v50  ;;  %v135_v60 = vsel %vm113_vm3, %v134_v48, %v130_v56 }
  0xb0   :  { %v71_v55 = vmul.f32 0.015625, %v55_v51  ;;  %v114_v61 = vsel %vm113_vm3, %v112_v49, %v107_v57 }
  0xb1   :  { %v139_v58 = vrot.slane %v75_v54, %v118_v47 }
  0xb2   :  { %v119_v59 = vrot.slane %v71_v55, %v118_v47 }
  0xb3   :  { %v140_v63 = vsel %vm120_vm4, %v139_v58, %v135_v60 }
  0xb4   :  { %v121_v62 = vsel %vm120_vm4, %v119_v59, %v114_v61 }
  0xb5   :  { %v142_v3 = vsel %vm141_vm5, %v140_v63, %v121_v62 }
  0xb6   :  { %402 = vmatmul.mubr.msk.f32.vlgmr.msra.gmra.mrb[0].mxu0 %vm143_vm6, %v142_v3 }
 0x189   :  { %v212_v7 = vpop.f32.mrb[0].mxu0 }
 0x18a   :  { %v213_v10 = vadd.f32 %v380_v6, %v212_v7  ;;  %v403_v11 = vpop.f32.mrb[1].mxu0 }
 0x18c   :  { %v216_v14 = vmax.f32 %v213_v10, 0.0 }
 0x18e   :  { %407 = vmatmul.mubr.msk.f32.vlgmr.msra.gmra.mrb[0].mxu1 %vm225_vm8, %v216_v14 }
 0x261   :  { %v299_v16 = vpop.f32.mrb[0].mxu1 }
 0x262   :  { %v300_v17 = vadd.f32 %v382_v15, %v299_v16  ;;  %v408_v18 = vpop.f32.mrb[1].mxu1 }
 0x264   :  { %v385_v19 = vmul.f32 -1.442695, %v300_v17 }
 0x266   :  { %422 = vpow2.f32 %v385_v19 }
 0x270   :  { %v423_v20 = vpop.eup %422 }
 0x271   :  { %v306_v21 = vadd.f32 1.0, %v423_v20 }
 0x273   :  { %424 = vrcp.f32 %v306_v21 }
 0x27d   :  { %v425_v23 = vpop.eup %424 }
 0x27e   :  { %v312_v24 = vrot.slane %v425_v23, %v311_v22  ;;  %v331_v26 = vrot.slane %v425_v23, %v330_v25 }
 0x280   :  { %318 = vbcast.lane.b32.xlu1 %v312_v24, 264  ;;  %314 = vbcast.lane.b32.xlu0 %v312_v24, 256 }
 0x284   :  { %322 = vbcast.lane.b32.xlu1 %v312_v24, 272  ;;  %333 = vbcast.lane.b32.xlu0 %v331_v26, 256 }
 0x288   :  { %326 = vbcast.lane.b32.xlu1 %v312_v24, 280  ;;  %341 = vbcast.lane.b32.xlu0 %v331_v26, 272 }
 0x28c   :  { %337 = vbcast.lane.b32.xlu1 %v331_v26, 264 }
 0x290   :  { %345 = vbcast.lane.b32.xlu1 %v331_v26, 280 }
 0x2f2   :  { %v319_v27 = vpop.permute.xlu1 %318  ;;  %v315_v28 = vpop.permute.xlu0 %314 }
 0x2f3   :  { %v348_v30 = vmul.f32 %v319_v27, %v536_v5  ;;  %v347_v31 = vmul.f32 %v315_v28, %v528_v1 }
 0x2f5   :  { %356 = vst.msk [vmem:[#allocation5 + $0x8] sm:$0xff] %vm43_vm0, %v348_v30  ;;  %355 = vst.msk [vmem:[#allocation5] sm:$0xff] %vm43_vm0, %v347_v31 }
 0x2f6   :  { %v323_v29 = vpop.permute.xlu1 %322  ;;  %v334_v32 = vpop.permute.xlu0 %333 }
 0x2f7   :  { %v349_v33 = vmul.f32 %v323_v29, %v544_v9  ;;  %v351_v34 = vmul.f32 %v334_v32, %v526_v0 }
 0x2f9   :  { %357 = vst.msk [vmem:[#allocation5 + $0x10] sm:$0xff] %vm43_vm0, %v349_v33  ;;  %359 = vst.msk [vmem:[#allocation5 + $0x20] sm:$0xff] %vm43_vm0, %v351_v34 }
 0x2fa   :  { %v327_v35 = vpop.permute.xlu1 %326  ;;  %v342_v36 = vpop.permute.xlu0 %341 }
 0x2fb   :  { %v350_v5 = vmul.f32 %v327_v35, %v552_v13  ;;  %v353_v1 = vmul.f32 %v342_v36, %v542_v8 }
 0x2fd   :  { %358 = vst.msk [vmem:[#allocation5 + $0x18] sm:$0xff] %vm43_vm0, %v350_v5  ;;  %361 = vst.msk [vmem:[#allocation5 + $0x30] sm:$0xff] %vm43_vm0, %v353_v1 }
 0x2fe   :  { %v338_v37 = vpop.permute.xlu1 %337 }
 0x2ff   :  { %v352_v38 = vmul.f32 %v338_v37, %v530_v2 }
 0x301   :  { %360 = vst.msk [vmem:[#allocation5 + $0x28] sm:$0xff] %vm43_vm0, %v352_v38 }
 0x302   :  { %v346_v0 = vpop.permute.xlu1 %345 }
 0x303   :  { %v354_v9 = vmul.f32 %v346_v0, %v550_v12 }
 0x305   :  { %362 = vst.msk [vmem:[#allocation5 + $0x38] sm:$0xff] %vm43_vm0, %v354_v9 }
 0x306   :  { %459 = shalt.err (!%p456_p12)
}
 0x307   :  { %s460_s21 = scalar_lea.hbm %s625_s5, 1024 }
 0x308   :  { %p461_p13 = scmp.ne.s32.totalorder %s625_s5, %s460_s21  ;;  %p464_p0 = scmp.lt.u32.totalorder %s460_s21, %s625_s5 }
 0x30a   :  { %p466_p1 = pnand %p464_p0, %p461_p13 }
 0x30c   :  { %469 = shalt.err (!%p466_p1)
}
 0x30d   :  { %374 = dma.vmem_to_hbm [thread:$0]  %s369_s3, 1024, %s625_s5, [#allocation4], %s475_s28, %s475_s28, %s476_s29  }
 0x30e   :  { %472 = dma.done.wait [#allocation4], 1024  }
 0x30f   :  { %473 = vsyncadd [#allocation4], 4294966272 }
 0x310   :  { %378 = vsyncpa [#allocation3], 1 }
 0x311   :  { %379 = vsyncpa [#allocation4], 1 }

</bundles_post_ra>
